<compile_context>
chip_gen: v6e
topology: v6e:2x2x1
jax: 0.10.0
libtpu: 0.0.40
codegen_flags: <defaults>
</compile_context>

<pallas_src>
import math

import jax
import jax.numpy as jnp
from jax.experimental import pallas as pl
from jax.experimental.pallas import tpu as pltpu


def _round_up(a, b):
    return ((a + b - 1) // b) * b


def _vmem_capacity_bytes():
    """Per-core VMEM capacity; conservative (v7x) fallback if the query fails."""
    try:
        cap = int(pltpu.get_tpu_info().vmem_capacity_bytes)
        if cap > 0:
            return cap
    except Exception:
        pass
    return 64 * 1024 * 1024  # v7x per-TensorCore VMEM (smallest of v5e/v6e/v7x)


def _vae_kernel(inv_sqrt_n, x_ref, wmu_t_ref, wdec_t_ref, mu_ref, hatx_ref):
    # mu = (x @ W_mu^T) / sqrt(N).  wmu_t is pre-transposed to [N, M_pad]:
    # the contraction is the RHS sublane dim -> MXU-native, no re-layout.
    mu_f32 = jnp.dot(x_ref[...], wmu_t_ref[...],
                     preferred_element_type=jnp.float32) * inv_sqrt_n
    mu_ref[...] = mu_f32.astype(mu_ref.dtype)

    # hat_x = (mu @ W_dec^T) / sqrt(N).  wdec_t is [M_pad, N].  Cast the tiny
    # activation to the weight's native dtype (NOT the weight to f32) so the
    # matmul stays on the native MXU path with f32 accumulation.
    hatx_f32 = jnp.dot(mu_f32.astype(wdec_t_ref.dtype), wdec_t_ref[...],
                       preferred_element_type=jnp.float32) * inv_sqrt_n
    hatx_ref[...] = hatx_f32.astype(hatx_ref.dtype)


def linear_vae_forward(x, w_mu, w_dec, var, *, tb=512, compute_dtype=None):
    """Pallas implementation of LinearVAE.forward.

    Args:
      x:     [..., N] input (flattened to [-1, N], like x.view(-1, N)).
      w_mu:  [M, N]  weight of self.mu  (PyTorch [out, in] layout).
      w_dec: [N, M]  weight of self.dec (PyTorch [out, in] layout).
      var:   [M]     the self.var parameter (passed through unchanged).
      tb:    max batch-tile rows per grid step.
      compute_dtype: optional dtype (e.g. jnp.bfloat16) to cast x / weights to
        for full-rate MXU; default None keeps the input dtype (exact semantics).

    Returns:
      (hat_x [B, N], mu [B, M], var [M])
    """
    M, N = w_mu.shape
    assert w_dec.shape == (N, M), "w_dec must be [input_dim, latent_dim]"
    out_dtype = x.dtype
    x2 = x.reshape(-1, N)
    B = x2.shape[0]

    if compute_dtype is not None:
        x2 = x2.astype(compute_dtype)
        w_mu = w_mu.astype(compute_dtype)
        w_dec = w_dec.astype(compute_dtype)

    # One-time wrapper-side transpose -> MXU-friendly [in, out] layouts.
    wmu_t = jnp.transpose(w_mu)    # [N, M]
    wdec_t = jnp.transpose(w_dec)  # [M, N]

    # Lane-dense mu output: pad the latent dim to a multiple of 128.  The zero
    # columns of wmu_t give zero mu columns, and the zero rows of wdec_t make
    # them contribute nothing to hat_x; mu is sliced back afterwards.
    M_pad = _round_up(M, 128)
    if M_pad != M:
        wmu_t = jnp.pad(wmu_t, ((0, 0), (0, M_pad - M)))
        wdec_t = jnp.pad(wdec_t, ((0, M_pad - M), (0, 0)))

    x_itemsize = jnp.dtype(x2.dtype).itemsize
    w_itemsize = jnp.dtype(wmu_t.dtype).itemsize
    o_itemsize = jnp.dtype(out_dtype).itemsize

    # ---------------- batch-tile selection --------------------------------
    B8 = _round_up(max(B, 1), 8)
    TB = min(_round_up(int(tb), 8), B8)
    # Prefer >= 2 grid tiles so the "parallel" batch axis can span both
    # TensorCores on v7x (the ~0.35us extra step is negligible on v5e/v6e).
    if B8 >= 16:
        TB = min(TB, _round_up((B8 + 1) // 2, 8))

    vmem_cap = _vmem_capacity_bytes()

    def work_bytes(tb_rows):
        w = 2 * N * M_pad * w_itemsize                    # both weights, 1 buffer each
        xb = 2 * tb_rows * N * x_itemsize                 # double-buffered x tile
        ob = 2 * tb_rows * (N + M_pad) * o_itemsize       # double-buffered mu + hat_x
        tmp = tb_rows * (N + M_pad) * 4                   # f32 in-kernel intermediates
        return w + xb + ob + tmp

    budget = int(0.5 * vmem_cap)
    while TB > 8 and work_bytes(TB) > budget:
        TB = max(8, _round_up(TB // 2, 8))

    B_pad = _round_up(max(B, 1), TB)
    if B_pad != B:
        x2 = jnp.pad(x2, ((0, B_pad - B), (0, 0)))
    num_tiles = B_pad // TB

    inv_sqrt_n = 1.0 / math.sqrt(float(N))
    kernel = lambda *refs: _vae_kernel(inv_sqrt_n, *refs)

    vmem_limit = int(min(max(int(1.5 * work_bytes(TB)), 16 * 1024 * 1024),
                         int(0.75 * vmem_cap)))

    flops = 4 * B_pad * N * M_pad  # two matmuls, 2*B*N*M each
    bytes_accessed = (B_pad * N * x_itemsize          # x
                      + 2 * M_pad * N * w_itemsize    # both weights (once)
                      + B_pad * M_pad * o_itemsize    # mu
                      + B_pad * N * o_itemsize)       # hat_x

    def _call(weight_pipeline_mode):
        if weight_pipeline_mode is None:
            wmu_spec = pl.BlockSpec((N, M_pad), lambda i: (0, 0))
            wdec_spec = pl.BlockSpec((M_pad, N), lambda i: (0, 0))
        else:
            wmu_spec = pl.BlockSpec((N, M_pad), lambda i: (0, 0),
                                    pipeline_mode=weight_pipeline_mode)
            wdec_spec = pl.BlockSpec((M_pad, N), lambda i: (0, 0),
                                     pipeline_mode=weight_pipeline_mode)
        return pl.pallas_call(
            kernel,
            out_shape=(
                jax.ShapeDtypeStruct((B_pad, M_pad), out_dtype),   # mu
                jax.ShapeDtypeStruct((B_pad, N), out_dtype),       # hat_x
            ),
            grid_spec=pltpu.PrefetchScalarGridSpec(
                num_scalar_prefetch=0,
                grid=(num_tiles,),
                in_specs=[
                    pl.BlockSpec((TB, N), lambda i: (i, 0)),       # x tile (pipelined)
                    wmu_spec,                                      # W_mu^T  (resident)
                    wdec_spec,                                     # W_dec^T (resident)
                ],
                out_specs=[
                    pl.BlockSpec((TB, M_pad), lambda i: (i, 0)),   # mu tile
                    pl.BlockSpec((TB, N), lambda i: (i, 0)),       # hat_x tile
                ],
            ),
            compiler_params=pltpu.CompilerParams(
                dimension_semantics=("parallel",),
                vmem_limit_bytes=vmem_limit,
            ),
            cost_estimate=pl.CostEstimate(
                flops=flops, transcendentals=0, bytes_accessed=bytes_accessed),
        )(x2, wmu_t, wdec_t)

    # Prefer single-buffered resident weights; fall back to default pipelining
    # if this JAX build rejects Buffered(1).
    if hasattr(pl, "Buffered"):
        try:
            mu, hat_x = _call(pl.Buffered(1))
        except Exception:
            mu, hat_x = _call(None)
    else:
        mu, hat_x = _call(None)

    if B_pad != B:
        mu = mu[:B]
        hat_x = hat_x[:B]
    if M_pad != M:
        mu = mu[:, :M]

    # var is returned unchanged (no compute in the PyTorch forward).
    return hat_x, mu, var


if __name__ == "__main__":
    # Small shapes consistent with the module: input_dim=N, latent_dim=M.
    # M=64 (< 128) also exercises the lane-dense latent padding path.
    B, N, M = 8, 256, 64

    key = jax.random.PRNGKey(0)
    kx, kwm, kwd = jax.random.split(key, 3)

    x = jax.random.normal(kx, (B, N), dtype=jnp.float32)
    w_mu = jax.random.normal(kwm, (M, N), dtype=jnp.float32)   # self.mu.weight  [M, N]
    w_dec = jax.random.normal(kwd, (N, M), dtype=jnp.float32)  # self.dec.weight [N, M]
    var = jnp.ones((M,), dtype=jnp.float32)                    # self.var

    hat_x, mu, var_out = linear_vae_forward(x, w_mu, w_dec, var)
    jax.block_until_ready((hat_x, mu, var_out))

    # Reference check in plain JAX.
    mu_ref = (x @ w_mu.T) / jnp.sqrt(jnp.float32(N))
    hatx_ref = (mu_ref @ w_dec.T) / jnp.sqrt(jnp.float32(N))
    assert mu.shape == (B, M) and hat_x.shape == (B, N)
    assert jnp.allclose(mu, mu_ref, atol=1e-3, rtol=1e-3)
    assert jnp.allclose(hat_x, hatx_ref, atol=1e-3, rtol=1e-3)
    assert jnp.allclose(var_out, var)

    print("KERNEL_OK")
</pallas_src>

<mosaic_0001>
module attributes {stable_mosaic.version = 11 : i64} {
  func.func @_lambda_(%arg0: i32, %arg1: memref<8x256xf32, #tpu.memory_space<vmem>>, %arg2: memref<256x128xf32, #tpu.memory_space<vmem>>, %arg3: memref<128x256xf32, #tpu.memory_space<vmem>>, %arg4: memref<8x128xf32, #tpu.memory_space<vmem>>, %arg5: memref<8x256xf32, #tpu.memory_space<vmem>>) attributes {dimension_semantics = [#tpu.dimension_semantics<parallel>], iteration_bounds = array<i64: 1>, scalar_prefetch = 0 : i64, scratch_operands = 0 : i64, tpu.core_type = #tpu.core_type<tc>, window_params = [{transform_indices = @transform_0, window_bounds = array<i64: 8, 256>}, {pipeline_mode = #tpu.pipeline_mode<synchronous>, transform_indices = @transform_1, window_bounds = array<i64: 256, 128>}, {pipeline_mode = #tpu.pipeline_mode<synchronous>, transform_indices = @transform_2, window_bounds = array<i64: 128, 256>}, {transform_indices = @transform_3, window_bounds = array<i64: 8, 128>}, {transform_indices = @transform_4, window_bounds = array<i64: 8, 256>}]} {
    %c0 = arith.constant 0 : index
    %c0_0 = arith.constant 0 : index
    %0 = vector.load %arg1[%c0, %c0_0] : memref<8x256xf32, #tpu.memory_space<vmem>>, vector<8x256xf32>
    %c0_1 = arith.constant 0 : index
    %c0_2 = arith.constant 0 : index
    %1 = vector.load %arg2[%c0_1, %c0_2] : memref<256x128xf32, #tpu.memory_space<vmem>>, vector<256x128xf32>
    %cst = arith.constant dense<0.000000e+00> : vector<8x128xf32>
    %2 = tpu.matmul %0, %1, %cst {dimension_numbers = #tpu.dot_dimension_numbers<[1], [0], [0], [1], [0, 0, 1, 1], [], []>} : vector<8x256xf32>, vector<256x128xf32>, vector<8x128xf32> -> vector<8x128xf32>
    %cst_3 = arith.constant 6.250000e-02 : f32
    %3 = vector.broadcast %cst_3 : f32 to vector<8x128xf32>
    %4 = arith.mulf %2, %3 : vector<8x128xf32>
    %c0_4 = arith.constant 0 : index
    %c0_5 = arith.constant 0 : index
    %5 = vector.load %arg4[%c0_4, %c0_5] : memref<8x128xf32, #tpu.memory_space<vmem>>, vector<8x128xf32>
    tpu.vector_store %arg4[%c0_4, %c0_5], %4 {strides = array<i32>} : memref<8x128xf32, #tpu.memory_space<vmem>>, vector<8x128xf32>,
    %c0_6 = arith.constant 0 : index
    %c0_7 = arith.constant 0 : index
    %6 = vector.load %arg3[%c0_6, %c0_7] : memref<128x256xf32, #tpu.memory_space<vmem>>, vector<128x256xf32>
    %cst_8 = arith.constant dense<0.000000e+00> : vector<8x256xf32>
    %7 = tpu.matmul %4, %6, %cst_8 {dimension_numbers = #tpu.dot_dimension_numbers<[1], [0], [0], [1], [0, 0, 1, 1], [], []>} : vector<8x128xf32>, vector<128x256xf32>, vector<8x256xf32> -> vector<8x256xf32>
    %cst_9 = arith.constant 6.250000e-02 : f32
    %8 = vector.broadcast %cst_9 : f32 to vector<8x256xf32>
    %9 = arith.mulf %7, %8 : vector<8x256xf32>
    %c0_10 = arith.constant 0 : index
    %c0_11 = arith.constant 0 : index
    %10 = vector.load %arg5[%c0_10, %c0_11] : memref<8x256xf32, #tpu.memory_space<vmem>>, vector<8x256xf32>
    tpu.vector_store %arg5[%c0_10, %c0_11], %9 {strides = array<i32>} : memref<8x256xf32, #tpu.memory_space<vmem>>, vector<8x256xf32>,
    return
  }
  func.func @transform_0(%arg0: i32) -> (i32, i32) {
    %c0_i32 = arith.constant 0 : i32
    %c0_i32_0 = arith.constant 0 : i32
    return %arg0, %c0_i32 : i32, i32
  }
  func.func @transform_1(%arg0: i32) -> (i32, i32) {
    %c0_i32 = arith.constant 0 : i32
    %c0_i32_0 = arith.constant 0 : i32
    %c0_i32_1 = arith.constant 0 : i32
    return %c0_i32, %c0_i32_0 : i32, i32
  }
  func.func @transform_2(%arg0: i32) -> (i32, i32) {
    %c0_i32 = arith.constant 0 : i32
    %c0_i32_0 = arith.constant 0 : i32
    %c0_i32_1 = arith.constant 0 : i32
    return %c0_i32, %c0_i32_0 : i32, i32
  }
  func.func @transform_3(%arg0: i32) -> (i32, i32) {
    %c0_i32 = arith.constant 0 : i32
    %c0_i32_0 = arith.constant 0 : i32
    return %arg0, %c0_i32 : i32, i32
  }
  func.func @transform_4(%arg0: i32) -> (i32, i32) {
    %c0_i32 = arith.constant 0 : i32
    %c0_i32_0 = arith.constant 0 : i32
    return %arg0, %c0_i32 : i32, i32
  }
}

module attributes {stable_mosaic.version = 11 : i64} {
  func.func @_lambda_(%arg0: i32, %arg1: memref<8x256xf32, #tpu.memory_space<vmem>>, %arg2: memref<256x128xf32, #tpu.memory_space<vmem>>, %arg3: memref<128x256xf32, #tpu.memory_space<vmem>>, %arg4: memref<8x128xf32, #tpu.memory_space<vmem>>, %arg5: memref<8x256xf32, #tpu.memory_space<vmem>>) attributes {dimension_semantics = [#tpu.dimension_semantics<parallel>], iteration_bounds = array<i64: 1>, scalar_prefetch = 0 : i64, scratch_operands = 0 : i64, tpu.core_type = #tpu.core_type<tc>, window_params = [{transform_indices = @transform_0, window_bounds = array<i64: 8, 256>}, {pipeline_mode = #tpu.pipeline_mode<synchronous>, transform_indices = @transform_1, window_bounds = array<i64: 256, 128>}, {pipeline_mode = #tpu.pipeline_mode<synchronous>, transform_indices = @transform_2, window_bounds = array<i64: 128, 256>}, {transform_indices = @transform_3, window_bounds = array<i64: 8, 128>}, {transform_indices = @transform_4, window_bounds = array<i64: 8, 256>}]} {
    %c0 = arith.constant 0 : index
    %c0_0 = arith.constant 0 : index
    %0 = vector.load %arg1[%c0, %c0_0] : memref<8x256xf32, #tpu.memory_space<vmem>>, vector<8x256xf32>
    %c0_1 = arith.constant 0 : index
    %c0_2 = arith.constant 0 : index
    %1 = vector.load %arg2[%c0_1, %c0_2] : memref<256x128xf32, #tpu.memory_space<vmem>>, vector<256x128xf32>
    %cst = arith.constant dense<0.000000e+00> : vector<8x128xf32>
    %2 = tpu.matmul %0, %1, %cst {dimension_numbers = #tpu.dot_dimension_numbers<[1], [0], [0], [1], [0, 0, 1, 1], [], []>} : vector<8x256xf32>, vector<256x128xf32>, vector<8x128xf32> -> vector<8x128xf32>
    %cst_3 = arith.constant 6.250000e-02 : f32
    %3 = vector.broadcast %cst_3 : f32 to vector<8x128xf32>
    %4 = arith.mulf %2, %3 : vector<8x128xf32>
    %c0_4 = arith.constant 0 : index
    %c0_5 = arith.constant 0 : index
    %5 = vector.load %arg4[%c0_4, %c0_5] : memref<8x128xf32, #tpu.memory_space<vmem>>, vector<8x128xf32>
    tpu.vector_store %arg4[%c0_4, %c0_5], %4 {strides = array<i32>} : memref<8x128xf32, #tpu.memory_space<vmem>>, vector<8x128xf32>,
    %c0_6 = arith.constant 0 : index
    %c0_7 = arith.constant 0 : index
    %6 = vector.load %arg3[%c0_6, %c0_7] : memref<128x256xf32, #tpu.memory_space<vmem>>, vector<128x256xf32>
    %cst_8 = arith.constant dense<0.000000e+00> : vector<8x256xf32>
    %7 = tpu.matmul %4, %6, %cst_8 {dimension_numbers = #tpu.dot_dimension_numbers<[1], [0], [0], [1], [0, 0, 1, 1], [], []>} : vector<8x128xf32>, vector<128x256xf32>, vector<8x256xf32> -> vector<8x256xf32>
    %cst_9 = arith.constant 6.250000e-02 : f32
    %8 = vector.broadcast %cst_9 : f32 to vector<8x256xf32>
    %9 = arith.mulf %7, %8 : vector<8x256xf32>
    %c0_10 = arith.constant 0 : index
    %c0_11 = arith.constant 0 : index
    %10 = vector.load %arg5[%c0_10, %c0_11] : memref<8x256xf32, #tpu.memory_space<vmem>>, vector<8x256xf32>
    tpu.vector_store %arg5[%c0_10, %c0_11], %9 {strides = array<i32>} : memref<8x256xf32, #tpu.memory_space<vmem>>, vector<8x256xf32>,
    return
  }
  func.func @transform_0(%arg0: i32) -> (i32, i32) {
    %c0_i32 = arith.constant 0 : i32
    %c0_i32_0 = arith.constant 0 : i32
    return %arg0, %c0_i32 : i32, i32
  }
  func.func @transform_1(%arg0: i32) -> (i32, i32) {
    %c0_i32 = arith.constant 0 : i32
    %c0_i32_0 = arith.constant 0 : i32
    %c0_i32_1 = arith.constant 0 : i32
    return %c0_i32, %c0_i32_0 : i32, i32
  }
  func.func @transform_2(%arg0: i32) -> (i32, i32) {
    %c0_i32 = arith.constant 0 : i32
    %c0_i32_0 = arith.constant 0 : i32
    %c0_i32_1 = arith.constant 0 : i32
    return %c0_i32, %c0_i32_0 : i32, i32
  }
  func.func @transform_3(%arg0: i32) -> (i32, i32) {
    %c0_i32 = arith.constant 0 : i32
    %c0_i32_0 = arith.constant 0 : i32
    return %arg0, %c0_i32 : i32, i32
  }
  func.func @transform_4(%arg0: i32) -> (i32, i32) {
    %c0_i32 = arith.constant 0 : i32
    %c0_i32_0 = arith.constant 0 : i32
    return %arg0, %c0_i32 : i32, i32
  }
}

</mosaic_0001>

<bundles_post_ra>
// kernel: tpu_custom_call.1
= control target key start
LH: loop header
LB: loop body
LE: loop exit
PB: predicated region body
PF: predicated region fallthrough
CT: control target
= control target key end

     0   :  { %10 = vsyncpa [#allocation3], 0  ;;  %s503_s0 = inlined_call_operand.hbm [shape: f32[8,256], index: 0, kind: input, shape index: {}]   ;;  %s504_s1 = inlined_call_operand.hbm [shape: f32[256,128], index: 1, kind: input, shape index: {}]   ;;  %s505_s2 = inlined_call_operand.hbm [shape: f32[128,256], index: 2, kind: input, shape index: {}]   ;;  %s506_s3 = inlined_call_operand.hbm [shape: f32[8,128], index: 3, kind: output, shape index: {0}]   ;;  %s507_s4 = inlined_call_operand.hbm [shape: f32[8,256], index: 4, kind: output, shape index: {1}]  }
   0x1   :  { %11 = vsyncpa [#allocation6], 0 }
   0x2   :  { %12 = vsyncpa [#allocation4], 0 }
   0x3   :  { %13 = vsyncpa [#allocation10], 0  ;;  %s453_s15 = smov [#allocation5]  }
   0x4   :  { %s29_s16 = sshll.u32 %s453_s15, 4  ;;  %s30_s16 = int_to_ptr.vmem [resolvable:$true] %s29_s16 }
   0x5   :  { %s353_s17 = scalar_lea.vmem %s30_s16, 4096  ;;  %p358_p1 = scmp.lt.s32.totalorder %s30_s16, %s30_s16 }
   0x6   :  { %p354_p0 = scmp.ne.s32.totalorder %s30_s16, %s353_s17  ;;  %p359_p2 = scmp.lt.s32.totalorder %s353_s17, %s353_s17 }
   0x8   :  { %p360_p3 = por %p359_p2, %p358_p1 }
   0xa   :  { %p361_p4 = pnand %p360_p3, %p354_p0 }
   0xc   :  { %364 = shalt.err (!%p361_p4)
}
   0xd   :  { %s454_s18 = smov 128   ;;  %s455_s19 = smov 8  }
   0xe   :  { %35 = dma.hbm_to_vmem [thread:$0]  %s504_s1, 4096, %s30_s16, [#allocation6], %s454_s18, %s454_s18, %s455_s19  }
   0xf   :  { %s456_s22 = smov [#allocation2]   ;;  %s457_s24 = smov [#allocation7]  }
  0x10   :  { %s20_s23 = sshll.u32 %s456_s22, 4  ;;  %s41_s25 = sshll.u32 %s457_s24, 4  ;;  %s21_s23 = int_to_ptr.vmem [resolvable:$true] %s20_s23  ;;  %s42_s25 = int_to_ptr.vmem [resolvable:$true] %s41_s25 }
  0x11   :  { %s373_s26 = scalar_lea.vmem %s21_s23, 256  ;;  %p378_p6 = scmp.lt.s32.totalorder %s21_s23, %s21_s23 }
  0x12   :  { %p374_p5 = scmp.ne.s32.totalorder %s21_s23, %s373_s26  ;;  %p379_p7 = scmp.lt.s32.totalorder %s373_s26, %s373_s26 }
  0x14   :  { %p380_p8 = por %p379_p7, %p378_p6 }
  0x16   :  { %p381_p9 = pnand %p380_p8, %p374_p5 }
  0x18   :  { %384 = shalt.err (!%p381_p9)
}
  0x19   :  { %23 = dma.hbm_to_vmem [thread:$0]  %s503_s0, 256, %s21_s23, [#allocation3]  }
  0x1a   :  { %s393_s29 = scalar_lea.vmem %s42_s25, 4096  ;;  %p398_p11 = scmp.lt.s32.totalorder %s42_s25, %s42_s25 }
  0x1b   :  { %p394_p10 = scmp.ne.s32.totalorder %s42_s25, %s393_s29  ;;  %p399_p12 = scmp.lt.s32.totalorder %s393_s29, %s393_s29 }
  0x1d   :  { %p400_p13 = por %p399_p12, %p398_p11 }
  0x1f   :  { %p401_p0 = pnand %p400_p13, %p394_p10 }
  0x21   :  { %404 = shalt.err (!%p401_p0)
}
  0x22   :  { %s458_s1 = smov 256   ;;  %s459_s30 = smov 16  }
  0x23   :  { %47 = dma.hbm_to_vmem [thread:$0]  %s505_s2, 4096, %s42_s25, [#allocation6], %s458_s1, %s458_s1, %s459_s30  }
  0x24   :  { %445 = dma.done.wait [#allocation3], 256  }
  0x25   :  { %446 = vsyncadd [#allocation3], 4294967040 }
  0x26   :  { %447 = dma.done.wait [#allocation6], 8192  }
  0x27   :  { %448 = vsyncadd [#allocation6], 4294959104  ;;  %v90_v0 = vld [vmem:[#allocation5 + $0xf8] sm:$0xff]  ;;  %v89_v2 = vld [vmem:[#allocation5 + $0xf0] sm:$0xff]  ;;  %s461_s0 = smov [#allocation8]  }
  0x28   :  { %v74_v1 = vld [vmem:[#allocation5 + $0x78] sm:$0xff]  ;;  %300 = vmatprep.subr.mxu0 %v90_v0  ;;  %v73_v3 = vld [vmem:[#allocation5 + $0x70] sm:$0xff]  ;;  %v88_v4 = vld [vmem:[#allocation5 + $0xe8] sm:$0xff]  ;;  %s276_s2 = sshll.u32 %s461_s0, 4  ;;  %s277_s2 = int_to_ptr.vmem [resolvable:$true] %s276_s2 }
  0x29   :  { %301 = vmatpush3.msra.mxu0 %v74_v1  ;;  %v72_v5 = vld [vmem:[#allocation5 + $0x68] sm:$0xff]  ;;  %v87_v6 = vld [vmem:[#allocation5 + $0xe0] sm:$0xff]  ;;  %v86_v8 = vld [vmem:[#allocation5 + $0xd8] sm:$0xff]  ;;  %s405_s7 = scalar_lea.vmem %s277_s2, 128  ;;  %p410_p2 = scmp.lt.s32.totalorder %s277_s2, %s277_s2 }
  0x2a   :  { %302 = vmatprep.subr.mxu0 %v89_v2  ;;  %v71_v7 = vld [vmem:[#allocation5 + $0x60] sm:$0xff]  ;;  %v70_v9 = vld [vmem:[#allocation5 + $0x58] sm:$0xff]  ;;  %v85_v10 = vld [vmem:[#allocation5 + $0xd0] sm:$0xff]  ;;  %v460_v2 = vmov 0.0   ;;  %p406_p1 = scmp.ne.s32.totalorder %s277_s2, %s405_s7  ;;  %p411_p3 = scmp.lt.s32.totalorder %s405_s7, %s405_s7 }
  0x2b   :  { %303 = vmatpush3.msra.mxu0 %v73_v3  ;;  %v69_v11 = vld [vmem:[#allocation5 + $0x50] sm:$0xff]  ;;  %v84_v12 = vld [vmem:[#allocation5 + $0xc8] sm:$0xff]  ;;  %v58_v13 = vld [vmem:[#allocation2 + $0x8] sm:$0xff]  ;;  %259 = vmatprep.mubr.f32.mxu1 %v460_v2 }
  0x2c   :  { %304 = vmatprep.subr.mxu0 %v88_v4  ;;  %v68_v14 = vld [vmem:[#allocation5 + $0x48] sm:$0xff]  ;;  %155 = vmatprep.mubr.f32.mxu0 %v58_v13  ;;  %v194_v15 = vld [vmem:[#allocation7 + $0xf8] sm:$0xff]  ;;  %v193_v16 = vld [vmem:[#allocation7 + $0xf0] sm:$0xff]  ;;  %p412_p4 = por %p411_p3, %p410_p2 }
  0x2d   :  { %305 = vmatpush3.msra.mxu0 %v72_v5  ;;  %v83_v17 = vld [vmem:[#allocation5 + $0xc0] sm:$0xff]  ;;  %195 = vmatprep.subr.mxu1 %v194_v15  ;;  %v192_v18 = vld [vmem:[#allocation7 + $0xe8] sm:$0xff]  ;;  %v190_v21 = vld [vmem:[#allocation7 + $0xd8] sm:$0xff] }
  0x2e   :  { %306 = vmatprep.subr.mxu0 %v87_v6  ;;  %v191_v19 = vld [vmem:[#allocation7 + $0xe0] sm:$0xff]  ;;  %196 = vmatpush1.msra.mxu1 %v193_v16  ;;  %v82_v22 = vld [vmem:[#allocation5 + $0xb8] sm:$0xff]  ;;  %v189_v23 = vld [vmem:[#allocation7 + $0xd0] sm:$0xff]  ;;  %p413_p5 = pnand %p412_p4, %p406_p1 }
  0x2f   :  { %307 = vmatpush3.msra.mxu0 %v71_v7  ;;  %v67_v20 = vld [vmem:[#allocation5 + $0x40] sm:$0xff]  ;;  %197 = vmatprep.subr.mxu1 %v192_v18  ;;  %v66_v24 = vld [vmem:[#allocation5 + $0x38] sm:$0xff]  ;;  %v188_v25 = vld [vmem:[#allocation7 + $0xc8] sm:$0xff] }
  0x30   :  { %308 = vmatprep.subr.mxu0 %v86_v8  ;;  %198 = vmatpush1.msra.mxu1 %v191_v19  ;;  %v81_v26 = vld [vmem:[#allocation5 + $0xb0] sm:$0xff]  ;;  %v187_v27 = vld [vmem:[#allocation7 + $0xc0] sm:$0xff]  ;;  %v186_v29 = vld [vmem:[#allocation7 + $0xb8] sm:$0xff] }
  0x31   :  { %309 = vmatpush3.msra.mxu0 %v70_v9  ;;  %199 = vmatprep.subr.mxu1 %v190_v21  ;;  %v65_v28 = vld [vmem:[#allocation5 + $0x30] sm:$0xff]  ;;  %v80_v30 = vld [vmem:[#allocation5 + $0xa8] sm:$0xff]  ;;  %v79_v34 = vld [vmem:[#allocation5 + $0xa0] sm:$0xff] }
  0x32   :  { %310 = vmatprep.subr.mxu0 %v85_v10  ;;  %200 = vmatpush1.msra.mxu1 %v189_v23  ;;  %v185_v31 = vld [vmem:[#allocation7 + $0xb0] sm:$0xff]  ;;  %v64_v32 = vld [vmem:[#allocation5 + $0x28] sm:$0xff]  ;;  %v183_v35 = vld [vmem:[#allocation7 + $0xa0] sm:$0xff] }
  0x33   :  { %311 = vmatpush3.msra.mxu0 %v69_v11  ;;  %201 = vmatprep.subr.mxu1 %v188_v25  ;;  %v184_v33 = vld [vmem:[#allocation7 + $0xa8] sm:$0xff]  ;;  %v63_v36 = vld [vmem:[#allocation5 + $0x20] sm:$0xff]  ;;  %v182_v37 = vld [vmem:[#allocation7 + $0x98] sm:$0xff] }
  0x34   :  { %312 = vmatprep.subr.mxu0 %v84_v12  ;;  %202 = vmatpush1.msra.mxu1 %v187_v27  ;;  %v78_v38 = vld [vmem:[#allocation5 + $0x98] sm:$0xff]  ;;  %v181_v39 = vld [vmem:[#allocation7 + $0x90] sm:$0xff]  ;;  %v180_v41 = vld [vmem:[#allocation7 + $0x88] sm:$0xff] }
  0x35   :  { %313 = vmatpush3.msra.mxu0 %v68_v14  ;;  %203 = vmatprep.subr.mxu1 %v186_v29  ;;  %v62_v40 = vld [vmem:[#allocation5 + $0x18] sm:$0xff]  ;;  %v77_v42 = vld [vmem:[#allocation5 + $0x90] sm:$0xff]  ;;  %v179_v43 = vld [vmem:[#allocation7 + $0x80] sm:$0xff] }
  0x36   :  { %314 = vmatprep.subr.mxu0 %v83_v17  ;;  %204 = vmatpush1.msra.mxu1 %v185_v31  ;;  %v61_v44 = vld [vmem:[#allocation5 + $0x10] sm:$0xff]  ;;  %v178_v45 = vld [vmem:[#allocation7 + $0x78] sm:$0xff]  ;;  %v76_v46 = vld [vmem:[#allocation5 + $0x88] sm:$0xff] }
  0x37   :  { %315 = vmatpush3.msra.mxu0 %v67_v20  ;;  %205 = vmatprep.subr.mxu1 %v184_v33  ;;  %v177_v47 = vld [vmem:[#allocation7 + $0x70] sm:$0xff]  ;;  %v60_v48 = vld [vmem:[#allocation5 + $0x8] sm:$0xff]  ;;  %v75_v50 = vld [vmem:[#allocation5 + $0x80] sm:$0xff] }
  0x38   :  { %316 = vmatprep.subr.mxu0 %v82_v22  ;;  %206 = vmatpush1.msra.mxu1 %v183_v35  ;;  %v176_v49 = vld [vmem:[#allocation7 + $0x68] sm:$0xff]  ;;  %v175_v51 = vld [vmem:[#allocation7 + $0x60] sm:$0xff]  ;;  %v174_v53 = vld [vmem:[#allocation7 + $0x58] sm:$0xff] }
  0x39   :  { %317 = vmatpush3.msra.mxu0 %v66_v24  ;;  %207 = vmatprep.subr.mxu1 %v182_v37  ;;  %v59_v52 = vld [vmem:[#allocation5] sm:$0xff]  ;;  %v57_v54 = vld [vmem:[#allocation2] sm:$0xff]  ;;  %v172_v56 = vld [vmem:[#allocation7 + $0x48] sm:$0xff] }
  0x3a   :  { %318 = vmatprep.subr.mxu0 %v81_v26  ;;  %208 = vmatpush1.msra.mxu1 %v181_v39  ;;  %v173_v55 = vld [vmem:[#allocation7 + $0x50] sm:$0xff]  ;;  %v171_v57 = vld [vmem:[#allocation7 + $0x40] sm:$0xff]  ;;  %v170_v58 = vld [vmem:[#allocation7 + $0x38] sm:$0xff] }
  0x3b   :  { %319 = vmatpush3.msra.mxu0 %v65_v28  ;;  %209 = vmatprep.subr.mxu1 %v180_v41  ;;  %v169_v59 = vld [vmem:[#allocation7 + $0x30] sm:$0xff]  ;;  %v168_v60 = vld [vmem:[#allocation7 + $0x28] sm:$0xff]  ;;  %v167_v61 = vld [vmem:[#allocation7 + $0x20] sm:$0xff] }
  0x3c   :  { %320 = vmatprep.subr.mxu0 %v80_v30  ;;  %210 = vmatpush1.msra.mxu1 %v179_v43  ;;  %v166_v62 = vld [vmem:[#allocation7 + $0x18] sm:$0xff]  ;;  %v165_v63 = vld [vmem:[#allocation7 + $0x10] sm:$0xff]  ;;  %v164_v0 = vld [vmem:[#allocation7 + $0x8] sm:$0xff] }
  0x3d   :  { %321 = vmatpush3.msra.mxu0 %v64_v32  ;;  %211 = vmatprep.subr.mxu1 %v178_v45  ;;  %v163_v1 = vld [vmem:[#allocation7] sm:$0xff] }
  0x3e   :  { %322 = vmatprep.subr.mxu0 %v79_v34  ;;  %212 = vmatpush1.msra.mxu1 %v177_v47 }
  0x3f   :  { %323 = vmatpush3.msra.mxu0 %v63_v36  ;;  %213 = vmatprep.subr.mxu1 %v176_v49 }
  0x40   :  { %324 = vmatprep.subr.mxu0 %v78_v38  ;;  %214 = vmatpush1.msra.mxu1 %v175_v51 }
  0x41   :  { %325 = vmatpush3.msra.mxu0 %v62_v40  ;;  %215 = vmatprep.subr.mxu1 %v174_v53 }
  0x42   :  { %326 = vmatprep.subr.mxu0 %v77_v42  ;;  %216 = vmatpush1.msra.mxu1 %v173_v55 }
  0x43   :  { %327 = vmatpush3.msra.mxu0 %v61_v44  ;;  %217 = vmatprep.subr.mxu1 %v172_v56 }
  0x44   :  { %328 = vmatprep.subr.mxu0 %v76_v46  ;;  %218 = vmatpush1.msra.mxu1 %v171_v57 }
  0x45   :  { %329 = vmatpush3.msra.mxu0 %v60_v48  ;;  %219 = vmatprep.subr.mxu1 %v170_v58 }
  0x46   :  { %330 = vmatprep.subr.mxu0 %v75_v50  ;;  %220 = vmatpush1.msra.mxu1 %v169_v59 }
  0x47   :  { %331 = vmatpush3.msra.mxu0 %v59_v52  ;;  %221 = vmatprep.subr.mxu1 %v168_v60 }
  0x48   :  { %156 = vmatmul.mubr.f32.vlgmr.msra.gmra.mxu0 %v57_v54  ;;  %222 = vmatpush1.msra.mxu1 %v167_v61 }
  0x49   :  { %223 = vmatprep.subr.mxu1 %v166_v62 }
  0x4a   :  { %224 = vmatpush1.msra.mxu1 %v165_v63 }
  0x4b   :  { %225 = vmatprep.subr.mxu1 %v164_v0 }
  0x4c   :  { %226 = vmatpush1.msra.mxu1 %v163_v1 }
 0x108   :  { %v332_v3 = vpop.f32.mrf.mxu0 }
 0x10a   :  { %v333_v4 = vpop.f32.mrf.mxu0 }
 0x10b   :  { %v334_v5 = vadd.f32 %v333_v4, %v332_v3 }
 0x10d   :  { %v161_v6 = vmul.f32 0.0625, %v334_v5 }
 0x10f   :  { %162 = vst [vmem:[#allocation8] sm:$0xff] %v161_v6  ;;  %260 = vmatmul.mubr.f32.vlgmr.msra.gmra.mxu1 %v161_v6 }
 0x110   :  { %416 = shalt.err (!%p413_p5)
}
 0x111   :  { %279 = dma.vmem_to_hbm [thread:$0]  %s277_s2, 128, %s506_s3, [#allocation4]  }
 0x112   :  { %s462_s10 = smov [#allocation9]  }
 0x113   :  { %s286_s11 = sshll.u32 %s462_s10, 4  ;;  %s287_s11 = int_to_ptr.vmem [resolvable:$true] %s286_s11 }
 0x114   :  { %s425_s12 = scalar_lea.vmem %s287_s11, 256  ;;  %p430_p7 = scmp.lt.s32.totalorder %s287_s11, %s287_s11 }
 0x115   :  { %p426_p6 = scmp.ne.s32.totalorder %s287_s11, %s425_s12  ;;  %p431_p8 = scmp.lt.s32.totalorder %s425_s12, %s425_s12 }
 0x117   :  { %p432_p9 = por %p431_p8, %p430_p7 }
 0x119   :  { %p433_p10 = pnand %p432_p9, %p426_p6 }
 0x1cf   :  { %v261_v7 = vpop.f32.mrf.mxu1 }
 0x1d0   :  { %v266_v8 = vmul.f32 0.0625, %v261_v7 }
 0x1d1   :  { %v263_v9 = vpop.f32.mrf.mxu1 }
 0x1d2   :  { %268 = vst [vmem:[#allocation9] sm:$0xff] %v266_v8  ;;  %v267_v10 = vmul.f32 0.0625, %v263_v9 }
 0x1d4   :  { %269 = vst [vmem:[#allocation9 + $0x8] sm:$0xff] %v267_v10 }
 0x1d5   :  { %436 = shalt.err (!%p433_p10)
}
 0x1d6   :  { %289 = dma.vmem_to_hbm [thread:$0]  %s287_s11, 256, %s507_s4, [#allocation10]  }
 0x1d7   :  { %449 = dma.done.wait [#allocation4], 128  }
 0x1d8   :  { %450 = vsyncadd [#allocation4], 4294967168 }
 0x1d9   :  { %451 = dma.done.wait [#allocation10], 256  }
 0x1da   :  { %452 = vsyncadd [#allocation10], 4294967040 }
 0x1db   :  { %296 = vsyncpa [#allocation3], 1 }
 0x1dc   :  { %297 = vsyncpa [#allocation6], 1 }
 0x1dd   :  { %298 = vsyncpa [#allocation4], 1 }
 0x1de   :  { %299 = vsyncpa [#allocation10], 1 }

// kernel: tpu_custom_call.1
= control target key start
LH: loop header
LB: loop body
LE: loop exit
PB: predicated region body
PF: predicated region fallthrough
CT: control target
= control target key end

     0   :  { %10 = vsyncpa [#allocation3], 0  ;;  %s503_s0 = inlined_call_operand.hbm [shape: f32[8,256], index: 0, kind: input, shape index: {}]   ;;  %s504_s1 = inlined_call_operand.hbm [shape: f32[256,128], index: 1, kind: input, shape index: {}]   ;;  %s505_s2 = inlined_call_operand.hbm [shape: f32[128,256], index: 2, kind: input, shape index: {}]   ;;  %s506_s3 = inlined_call_operand.hbm [shape: f32[8,128], index: 3, kind: output, shape index: {0}]   ;;  %s507_s4 = inlined_call_operand.hbm [shape: f32[8,256], index: 4, kind: output, shape index: {1}]  }
   0x1   :  { %11 = vsyncpa [#allocation6], 0 }
   0x2   :  { %12 = vsyncpa [#allocation4], 0 }
   0x3   :  { %13 = vsyncpa [#allocation10], 0  ;;  %s453_s15 = smov [#allocation5]  }
   0x4   :  { %s29_s16 = sshll.u32 %s453_s15, 4  ;;  %s30_s16 = int_to_ptr.vmem [resolvable:$true] %s29_s16 }
   0x5   :  { %s353_s17 = scalar_lea.vmem %s30_s16, 4096  ;;  %p358_p1 = scmp.lt.s32.totalorder %s30_s16, %s30_s16 }
   0x6   :  { %p354_p0 = scmp.ne.s32.totalorder %s30_s16, %s353_s17  ;;  %p359_p2 = scmp.lt.s32.totalorder %s353_s17, %s353_s17 }
   0x8   :  { %p360_p3 = por %p359_p2, %p358_p1 }
   0xa   :  { %p361_p4 = pnand %p360_p3, %p354_p0 }
   0xc   :  { %364 = shalt.err (!%p361_p4)
}
   0xd   :  { %s454_s18 = smov 128   ;;  %s455_s19 = smov 8  }
   0xe   :  { %35 = dma.hbm_to_vmem [thread:$0]  %s504_s1, 4096, %s30_s16, [#allocation6], %s454_s18, %s454_s18, %s455_s19  }
   0xf   :  { %s456_s22 = smov [#allocation2]   ;;  %s457_s24 = smov [#allocation7]  }
  0x10   :  { %s20_s23 = sshll.u32 %s456_s22, 4  ;;  %s41_s25 = sshll.u32 %s457_s24, 4  ;;  %s21_s23 = int_to_ptr.vmem [resolvable:$true] %s20_s23  ;;  %s42_s25 = int_to_ptr.vmem [resolvable:$true] %s41_s25 }
  0x11   :  { %s373_s26 = scalar_lea.vmem %s21_s23, 256  ;;  %p378_p6 = scmp.lt.s32.totalorder %s21_s23, %s21_s23 }
  0x12   :  { %p374_p5 = scmp.ne.s32.totalorder %s21_s23, %s373_s26  ;;  %p379_p7 = scmp.lt.s32.totalorder %s373_s26, %s373_s26 }
  0x14   :  { %p380_p8 = por %p379_p7, %p378_p6 }
  0x16   :  { %p381_p9 = pnand %p380_p8, %p374_p5 }
  0x18   :  { %384 = shalt.err (!%p381_p9)
}
  0x19   :  { %23 = dma.hbm_to_vmem [thread:$0]  %s503_s0, 256, %s21_s23, [#allocation3]  }
  0x1a   :  { %s393_s29 = scalar_lea.vmem %s42_s25, 4096  ;;  %p398_p11 = scmp.lt.s32.totalorder %s42_s25, %s42_s25 }
  0x1b   :  { %p394_p10 = scmp.ne.s32.totalorder %s42_s25, %s393_s29  ;;  %p399_p12 = scmp.lt.s32.totalorder %s393_s29, %s393_s29 }
  0x1d   :  { %p400_p13 = por %p399_p12, %p398_p11 }
  0x1f   :  { %p401_p0 = pnand %p400_p13, %p394_p10 }
  0x21   :  { %404 = shalt.err (!%p401_p0)
}
  0x22   :  { %s458_s1 = smov 256   ;;  %s459_s30 = smov 16  }
  0x23   :  { %47 = dma.hbm_to_vmem [thread:$0]  %s505_s2, 4096, %s42_s25, [#allocation6], %s458_s1, %s458_s1, %s459_s30  }
  0x24   :  { %445 = dma.done.wait [#allocation3], 256  }
  0x25   :  { %446 = vsyncadd [#allocation3], 4294967040 }
  0x26   :  { %447 = dma.done.wait [#allocation6], 8192  }
  0x27   :  { %448 = vsyncadd [#allocation6], 4294959104  ;;  %v90_v0 = vld [vmem:[#allocation5 + $0xf8] sm:$0xff]  ;;  %v89_v2 = vld [vmem:[#allocation5 + $0xf0] sm:$0xff]  ;;  %s461_s0 = smov [#allocation8]  }
  0x28   :  { %v74_v1 = vld [vmem:[#allocation5 + $0x78] sm:$0xff]  ;;  %300 = vmatprep.subr.mxu0 %v90_v0  ;;  %v73_v3 = vld [vmem:[#allocation5 + $0x70] sm:$0xff]  ;;  %v88_v4 = vld [vmem:[#allocation5 + $0xe8] sm:$0xff]  ;;  %s276_s2 = sshll.u32 %s461_s0, 4  ;;  %s277_s2 = int_to_ptr.vmem [resolvable:$true] %s276_s2 }
  0x29   :  { %301 = vmatpush3.msra.mxu0 %v74_v1  ;;  %v72_v5 = vld [vmem:[#allocation5 + $0x68] sm:$0xff]  ;;  %v87_v6 = vld [vmem:[#allocation5 + $0xe0] sm:$0xff]  ;;  %v86_v8 = vld [vmem:[#allocation5 + $0xd8] sm:$0xff]  ;;  %s405_s7 = scalar_lea.vmem %s277_s2, 128  ;;  %p410_p2 = scmp.lt.s32.totalorder %s277_s2, %s277_s2 }
  0x2a   :  { %302 = vmatprep.subr.mxu0 %v89_v2  ;;  %v71_v7 = vld [vmem:[#allocation5 + $0x60] sm:$0xff]  ;;  %v70_v9 = vld [vmem:[#allocation5 + $0x58] sm:$0xff]  ;;  %v85_v10 = vld [vmem:[#allocation5 + $0xd0] sm:$0xff]  ;;  %v460_v2 = vmov 0.0   ;;  %p406_p1 = scmp.ne.s32.totalorder %s277_s2, %s405_s7  ;;  %p411_p3 = scmp.lt.s32.totalorder %s405_s7, %s405_s7 }
  0x2b   :  { %303 = vmatpush3.msra.mxu0 %v73_v3  ;;  %v69_v11 = vld [vmem:[#allocation5 + $0x50] sm:$0xff]  ;;  %v84_v12 = vld [vmem:[#allocation5 + $0xc8] sm:$0xff]  ;;  %v58_v13 = vld [vmem:[#allocation2 + $0x8] sm:$0xff]  ;;  %259 = vmatprep.mubr.f32.mxu1 %v460_v2 }
  0x2c   :  { %304 = vmatprep.subr.mxu0 %v88_v4  ;;  %v68_v14 = vld [vmem:[#allocation5 + $0x48] sm:$0xff]  ;;  %155 = vmatprep.mubr.f32.mxu0 %v58_v13  ;;  %v194_v15 = vld [vmem:[#allocation7 + $0xf8] sm:$0xff]  ;;  %v193_v16 = vld [vmem:[#allocation7 + $0xf0] sm:$0xff]  ;;  %p412_p4 = por %p411_p3, %p410_p2 }
  0x2d   :  { %305 = vmatpush3.msra.mxu0 %v72_v5  ;;  %v83_v17 = vld [vmem:[#allocation5 + $0xc0] sm:$0xff]  ;;  %195 = vmatprep.subr.mxu1 %v194_v15  ;;  %v192_v18 = vld [vmem:[#allocation7 + $0xe8] sm:$0xff]  ;;  %v190_v21 = vld [vmem:[#allocation7 + $0xd8] sm:$0xff] }
  0x2e   :  { %306 = vmatprep.subr.mxu0 %v87_v6  ;;  %v191_v19 = vld [vmem:[#allocation7 + $0xe0] sm:$0xff]  ;;  %196 = vmatpush1.msra.mxu1 %v193_v16  ;;  %v82_v22 = vld [vmem:[#allocation5 + $0xb8] sm:$0xff]  ;;  %v189_v23 = vld [vmem:[#allocation7 + $0xd0] sm:$0xff]  ;;  %p413_p5 = pnand %p412_p4, %p406_p1 }
  0x2f   :  { %307 = vmatpush3.msra.mxu0 %v71_v7  ;;  %v67_v20 = vld [vmem:[#allocation5 + $0x40] sm:$0xff]  ;;  %197 = vmatprep.subr.mxu1 %v192_v18  ;;  %v66_v24 = vld [vmem:[#allocation5 + $0x38] sm:$0xff]  ;;  %v188_v25 = vld [vmem:[#allocation7 + $0xc8] sm:$0xff] }
  0x30   :  { %308 = vmatprep.subr.mxu0 %v86_v8  ;;  %198 = vmatpush1.msra.mxu1 %v191_v19  ;;  %v81_v26 = vld [vmem:[#allocation5 + $0xb0] sm:$0xff]  ;;  %v187_v27 = vld [vmem:[#allocation7 + $0xc0] sm:$0xff]  ;;  %v186_v29 = vld [vmem:[#allocation7 + $0xb8] sm:$0xff] }
  0x31   :  { %309 = vmatpush3.msra.mxu0 %v70_v9  ;;  %199 = vmatprep.subr.mxu1 %v190_v21  ;;  %v65_v28 = vld [vmem:[#allocation5 + $0x30] sm:$0xff]  ;;  %v80_v30 = vld [vmem:[#allocation5 + $0xa8] sm:$0xff]  ;;  %v79_v34 = vld [vmem:[#allocation5 + $0xa0] sm:$0xff] }
  0x32   :  { %310 = vmatprep.subr.mxu0 %v85_v10  ;;  %200 = vmatpush1.msra.mxu1 %v189_v23  ;;  %v185_v31 = vld [vmem:[#allocation7 + $0xb0] sm:$0xff]  ;;  %v64_v32 = vld [vmem:[#allocation5 + $0x28] sm:$0xff]  ;;  %v183_v35 = vld [vmem:[#allocation7 + $0xa0] sm:$0xff] }
  0x33   :  { %311 = vmatpush3.msra.mxu0 %v69_v11  ;;  %201 = vmatprep.subr.mxu1 %v188_v25  ;;  %v184_v33 = vld [vmem:[#allocation7 + $0xa8] sm:$0xff]  ;;  %v63_v36 = vld [vmem:[#allocation5 + $0x20] sm:$0xff]  ;;  %v182_v37 = vld [vmem:[#allocation7 + $0x98] sm:$0xff] }
  0x34   :  { %312 = vmatprep.subr.mxu0 %v84_v12  ;;  %202 = vmatpush1.msra.mxu1 %v187_v27  ;;  %v78_v38 = vld [vmem:[#allocation5 + $0x98] sm:$0xff]  ;;  %v181_v39 = vld [vmem:[#allocation7 + $0x90] sm:$0xff]  ;;  %v180_v41 = vld [vmem:[#allocation7 + $0x88] sm:$0xff] }
  0x35   :  { %313 = vmatpush3.msra.mxu0 %v68_v14  ;;  %203 = vmatprep.subr.mxu1 %v186_v29  ;;  %v62_v40 = vld [vmem:[#allocation5 + $0x18] sm:$0xff]  ;;  %v77_v42 = vld [vmem:[#allocation5 + $0x90] sm:$0xff]  ;;  %v179_v43 = vld [vmem:[#allocation7 + $0x80] sm:$0xff] }
  0x36   :  { %314 = vmatprep.subr.mxu0 %v83_v17  ;;  %204 = vmatpush1.msra.mxu1 %v185_v31  ;;  %v61_v44 = vld [vmem:[#allocation5 + $0x10] sm:$0xff]  ;;  %v178_v45 = vld [vmem:[#allocation7 + $0x78] sm:$0xff]  ;;  %v76_v46 = vld [vmem:[#allocation5 + $0x88] sm:$0xff] }
  0x37   :  { %315 = vmatpush3.msra.mxu0 %v67_v20  ;;  %205 = vmatprep.subr.mxu1 %v184_v33  ;;  %v177_v47 = vld [vmem:[#allocation7 + $0x70] sm:$0xff]  ;;  %v60_v48 = vld [vmem:[#allocation5 + $0x8] sm:$0xff]  ;;  %v75_v50 = vld [vmem:[#allocation5 + $0x80] sm:$0xff] }
  0x38   :  { %316 = vmatprep.subr.mxu0 %v82_v22  ;;  %206 = vmatpush1.msra.mxu1 %v183_v35  ;;  %v176_v49 = vld [vmem:[#allocation7 + $0x68] sm:$0xff]  ;;  %v175_v51 = vld [vmem:[#allocation7 + $0x60] sm:$0xff]  ;;  %v174_v53 = vld [vmem:[#allocation7 + $0x58] sm:$0xff] }
  0x39   :  { %317 = vmatpush3.msra.mxu0 %v66_v24  ;;  %207 = vmatprep.subr.mxu1 %v182_v37  ;;  %v59_v52 = vld [vmem:[#allocation5] sm:$0xff]  ;;  %v57_v54 = vld [vmem:[#allocation2] sm:$0xff]  ;;  %v172_v56 = vld [vmem:[#allocation7 + $0x48] sm:$0xff] }
  0x3a   :  { %318 = vmatprep.subr.mxu0 %v81_v26  ;;  %208 = vmatpush1.msra.mxu1 %v181_v39  ;;  %v173_v55 = vld [vmem:[#allocation7 + $0x50] sm:$0xff]  ;;  %v171_v57 = vld [vmem:[#allocation7 + $0x40] sm:$0xff]  ;;  %v170_v58 = vld [vmem:[#allocation7 + $0x38] sm:$0xff] }
  0x3b   :  { %319 = vmatpush3.msra.mxu0 %v65_v28  ;;  %209 = vmatprep.subr.mxu1 %v180_v41  ;;  %v169_v59 = vld [vmem:[#allocation7 + $0x30] sm:$0xff]  ;;  %v168_v60 = vld [vmem:[#allocation7 + $0x28] sm:$0xff]  ;;  %v167_v61 = vld [vmem:[#allocation7 + $0x20] sm:$0xff] }
  0x3c   :  { %320 = vmatprep.subr.mxu0 %v80_v30  ;;  %210 = vmatpush1.msra.mxu1 %v179_v43  ;;  %v166_v62 = vld [vmem:[#allocation7 + $0x18] sm:$0xff]  ;;  %v165_v63 = vld [vmem:[#allocation7 + $0x10] sm:$0xff]  ;;  %v164_v0 = vld [vmem:[#allocation7 + $0x8] sm:$0xff] }
  0x3d   :  { %321 = vmatpush3.msra.mxu0 %v64_v32  ;;  %211 = vmatprep.subr.mxu1 %v178_v45  ;;  %v163_v1 = vld [vmem:[#allocation7] sm:$0xff] }
  0x3e   :  { %322 = vmatprep.subr.mxu0 %v79_v34  ;;  %212 = vmatpush1.msra.mxu1 %v177_v47 }
  0x3f   :  { %323 = vmatpush3.msra.mxu0 %v63_v36  ;;  %213 = vmatprep.subr.mxu1 %v176_v49 }
  0x40   :  { %324 = vmatprep.subr.mxu0 %v78_v38  ;;  %214 = vmatpush1.msra.mxu1 %v175_v51 }
  0x41   :  { %325 = vmatpush3.msra.mxu0 %v62_v40  ;;  %215 = vmatprep.subr.mxu1 %v174_v53 }
  0x42   :  { %326 = vmatprep.subr.mxu0 %v77_v42  ;;  %216 = vmatpush1.msra.mxu1 %v173_v55 }
  0x43   :  { %327 = vmatpush3.msra.mxu0 %v61_v44  ;;  %217 = vmatprep.subr.mxu1 %v172_v56 }
  0x44   :  { %328 = vmatprep.subr.mxu0 %v76_v46  ;;  %218 = vmatpush1.msra.mxu1 %v171_v57 }
  0x45   :  { %329 = vmatpush3.msra.mxu0 %v60_v48  ;;  %219 = vmatprep.subr.mxu1 %v170_v58 }
  0x46   :  { %330 = vmatprep.subr.mxu0 %v75_v50  ;;  %220 = vmatpush1.msra.mxu1 %v169_v59 }
  0x47   :  { %331 = vmatpush3.msra.mxu0 %v59_v52  ;;  %221 = vmatprep.subr.mxu1 %v168_v60 }
  0x48   :  { %156 = vmatmul.mubr.f32.vlgmr.msra.gmra.mxu0 %v57_v54  ;;  %222 = vmatpush1.msra.mxu1 %v167_v61 }
  0x49   :  { %223 = vmatprep.subr.mxu1 %v166_v62 }
  0x4a   :  { %224 = vmatpush1.msra.mxu1 %v165_v63 }
  0x4b   :  { %225 = vmatprep.subr.mxu1 %v164_v0 }
  0x4c   :  { %226 = vmatpush1.msra.mxu1 %v163_v1 }
 0x108   :  { %v332_v3 = vpop.f32.mrf.mxu0 }
 0x10a   :  { %v333_v4 = vpop.f32.mrf.mxu0 }
 0x10b   :  { %v334_v5 = vadd.f32 %v333_v4, %v332_v3 }
 0x10d   :  { %v161_v6 = vmul.f32 0.0625, %v334_v5 }
 0x10f   :  { %162 = vst [vmem:[#allocation8] sm:$0xff] %v161_v6  ;;  %260 = vmatmul.mubr.f32.vlgmr.msra.gmra.mxu1 %v161_v6 }
 0x110   :  { %416 = shalt.err (!%p413_p5)
}
 0x111   :  { %279 = dma.vmem_to_hbm [thread:$0]  %s277_s2, 128, %s506_s3, [#allocation4]  }
 0x112   :  { %s462_s10 = smov [#allocation9]  }
 0x113   :  { %s286_s11 = sshll.u32 %s462_s10, 4  ;;  %s287_s11 = int_to_ptr.vmem [resolvable:$true] %s286_s11 }
 0x114   :  { %s425_s12 = scalar_lea.vmem %s287_s11, 256  ;;  %p430_p7 = scmp.lt.s32.totalorder %s287_s11, %s287_s11 }
 0x115   :  { %p426_p6 = scmp.ne.s32.totalorder %s287_s11, %s425_s12  ;;  %p431_p8 = scmp.lt.s32.totalorder %s425_s12, %s425_s12 }
 0x117   :  { %p432_p9 = por %p431_p8, %p430_p7 }
 0x119   :  { %p433_p10 = pnand %p432_p9, %p426_p6 }
 0x1cf   :  { %v261_v7 = vpop.f32.mrf.mxu1 }
 0x1d0   :  { %v266_v8 = vmul.f32 0.0625, %v261_v7 }
 0x1d1   :  { %v263_v9 = vpop.f32.mrf.mxu1 }
 0x1d2   :  { %268 = vst [vmem:[#allocation9] sm:$0xff] %v266_v8  ;;  %v267_v10 = vmul.f32 0.0625, %v263_v9 }
 0x1d4   :  { %269 = vst [vmem:[#allocation9 + $0x8] sm:$0xff] %v267_v10 }
 0x1d5   :  { %436 = shalt.err (!%p433_p10)
}
 0x1d6   :  { %289 = dma.vmem_to_hbm [thread:$0]  %s287_s11, 256, %s507_s4, [#allocation10]  }
 0x1d7   :  { %449 = dma.done.wait [#allocation4], 128  }
 0x1d8   :  { %450 = vsyncadd [#allocation4], 4294967168 }
 0x1d9   :  { %451 = dma.done.wait [#allocation10], 256  }
 0x1da   :  { %452 = vsyncadd [#allocation10], 4294967040 }
 0x1db   :  { %296 = vsyncpa [#allocation3], 1 }
 0x1dc   :  { %297 = vsyncpa [#allocation6], 1 }
 0x1dd   :  { %298 = vsyncpa [#allocation4], 1 }
 0x1de   :  { %299 = vsyncpa [#allocation10], 1 }

</bundles_post_ra>
